<compile_context>
chip_gen: v5e
topology: v5e:2x2
jax: 0.10.0
libtpu: 0.0.40
codegen_flags: <defaults>
</compile_context>

<pallas_src>
import functools

import jax
import jax.numpy as jnp
from jax.experimental import pallas as pl
from jax.experimental.pallas import tpu as pltpu

P_NOISY = 0.2  # module's p_noisy constructor argument


def _noisy_ce_kernel(logits_ref, targets_ref, out_ref, *, n_total, p_noisy):
    # logits_ref : (TILE_N, C) float   -- VMEM tile (auto double-buffered)
    # targets_ref: (TILE_N, 1) int32   -- VMEM tile
    # out_ref    : (1, 1, 1) float32   -- this tile's partial (masked) sum
    i = pl.program_id(0)

    x = logits_ref[...].astype(jnp.float32)          # (TILE_N, C)
    t = targets_ref[...]                             # (TILE_N, 1) int32
    tn, c = x.shape

    # Single f32 target mask via lane iota: no gather, no separate one-hot temp.
    col = jax.lax.broadcasted_iota(jnp.int32, (tn, c), 1)
    mask = (col == t).astype(jnp.float32)            # (TILE_N, C)

    # Numerically stable per-row logsumexp: one (TILE_N, C) exp, (TILE_N, 1) log.
    m = jnp.max(x, axis=1, keepdims=True)            # (TILE_N, 1)
    ex = jnp.exp(x - m)                              # <= 1, even on padded rows
    lse = m + jnp.log(jnp.sum(ex, axis=1, keepdims=True))   # (TILE_N, 1)

    logit_t = jnp.sum(x * mask, axis=1, keepdims=True)       # x[row, t[row]]
    onehot_sum = jnp.sum(mask, axis=1, keepdims=True)        # one_hot(t).sum(1)

    ce = lse - logit_t                               # per-row CE (reduction='none')
    w = 1.0 - p_noisy * onehot_sum                   # == 1 - p + p*(1 - onehot_sum)

    # Mask rows past the true batch size (final partial tile). This is the only
    # guard against padded-row garbage (incl. NaN/Inf through the lse path), keep it.
    row = i * tn + jax.lax.broadcasted_iota(jnp.int32, (tn, 1), 0)
    valid = row < n_total                            # (TILE_N, 1) bool
    contrib = jnp.sum(jnp.where(valid, ce * w, 0.0))

    out_ref[...] = jnp.reshape(contrib, (1, 1, 1))


def noisy_cross_entropy_loss(logits, targets, *, p_noisy=P_NOISY, tile_n=None):
    """logits: (N, C) float, targets: (N,) int -> scalar float32 loss."""
    n, c = logits.shape
    itemsize = logits.dtype.itemsize

    if tile_n is None:
        # Byte-based tile sizing: keep the whole VMEM working set under ~32 MiB:
        #   2 logits buffers (double-buffer)            : 2 * c * itemsize  per row
        #   ~5 live (TILE_N, C) f32/i32 temporaries     : 5 * c * 4         per row
        #   2 targets buffers, (TILE_N,1) i32 lane-pads : 2 * 128 * 4       per row
        # Safe on every generation (v5e/v6e 128 MiB, v7x 64 MiB physical VMEM) and
        # puts the logits tile in the multi-MiB DMA sweet spot.
        budget = 32 * 1024 * 1024
        per_row = 2 * c * itemsize + 5 * c * 4 + 2 * 128 * 4
        tile_n = max(8, (budget // per_row) // 8 * 8)
        n_pad = max(8, ((n + 7) // 8) * 8)
        tile_n = min(tile_n, n_pad)
        # TODO(synk): for vocab-scale C (tile_n collapsing toward 8 rows), add a
        # second grid axis over C with an online (streaming) logsumexp instead.

    num_tiles = pl.cdiv(n, tile_n)
    targets2d = targets.astype(jnp.int32).reshape(n, 1)

    # Explicit VMEM limit: double-buffered inputs + temporaries + slack, so we never
    # trip the default scoped limits (16 MiB v5e / 32 MiB v6e,v7x) nor v7x's 64 MiB.
    logits_buf = tile_n * c * itemsize
    targets_buf = tile_n * 128 * 4                 # lane-padded int32 block
    temps = 5 * tile_n * c * 4
    vmem_limit = 2 * logits_buf + 2 * targets_buf + temps + (2 << 20)
    vmem_limit = int(min(max(vmem_limit, 16 << 20), 56 << 20))

    kernel = functools.partial(_noisy_ce_kernel, n_total=n, p_noisy=float(p_noisy))
    partials = pl.pallas_call(
        kernel,
        out_shape=jax.ShapeDtypeStruct((num_tiles, 1, 1), jnp.float32),
        grid=(num_tiles,),
        in_specs=[
            pl.BlockSpec((tile_n, c), lambda i: (i, 0)),
            pl.BlockSpec((tile_n, 1), lambda i: (i, 0)),
        ],
        out_specs=pl.BlockSpec((1, 1, 1), lambda i: (i, 0, 0)),
        compiler_params=pltpu.CompilerParams(
            # No carried state across tiles -> row axis is truly parallel; on v7x the
            # grid can shard across both TensorCores of the megacore.
            dimension_semantics=("parallel",),
            vmem_limit_bytes=vmem_limit,
        ),
    )(logits, targets2d)

    # Final tree reduce + global mean in the wrapper (better precision than a single
    # carried f32 accumulator for very large N).
    return jnp.sum(partials) / jnp.float32(n)


def _reference(logits, targets, p_noisy):
    x = logits.astype(jnp.float32)
    c = x.shape[1]
    log_probs = jax.nn.log_softmax(x, axis=1)
    losses = -jnp.take_along_axis(log_probs, targets[:, None].astype(jnp.int32), axis=1)[:, 0]
    one_hot_sum = jnp.sum(jax.nn.one_hot(targets, c, dtype=jnp.float32), axis=1)
    weights = 1.0 - p_noisy + p_noisy * (1.0 - one_hot_sum)
    return jnp.mean(losses * weights)


if __name__ == "__main__":
    key = jax.random.PRNGKey(0)

    # Small test with an explicit tile -> 3-step grid incl. a partial final tile.
    k1, k2 = jax.random.split(key)
    N, C = 20, 32
    logits = jax.random.normal(k1, (N, C), dtype=jnp.float32)
    targets = jax.random.randint(k2, (N,), 0, C, dtype=jnp.int32)
    loss = noisy_cross_entropy_loss(logits, targets, p_noisy=P_NOISY, tile_n=8)
    jax.block_until_ready(loss)
    ref = _reference(logits, targets, P_NOISY)
    assert jnp.allclose(loss, ref, rtol=1e-5, atol=1e-5), (loss, ref)

    # Auto-tiled path (lane-aligned C) as a second sanity check.
    k3, k4 = jax.random.split(k1)
    N2, C2 = 64, 128
    logits2 = jax.random.normal(k3, (N2, C2), dtype=jnp.float32)
    targets2 = jax.random.randint(k4, (N2,), 0, C2, dtype=jnp.int32)
    loss2 = noisy_cross_entropy_loss(logits2, targets2, p_noisy=P_NOISY)
    jax.block_until_ready(loss2)
    ref2 = _reference(logits2, targets2, P_NOISY)
    assert jnp.allclose(loss2, ref2, rtol=1e-5, atol=1e-5), (loss2, ref2)

    print("KERNEL_OK")
</pallas_src>

<mosaic_0001>
module attributes {stable_mosaic.version = 11 : i64} {
  func.func @_noisy_ce_kernel(%arg0: i32, %arg1: memref<8x32xf32, #tpu.memory_space<vmem>>, %arg2: memref<8x1xi32, #tpu.memory_space<vmem>>, %arg3: memref<1x1x1xf32, #tpu.memory_space<vmem>>) attributes {dimension_semantics = [#tpu.dimension_semantics<parallel>], iteration_bounds = array<i64: 3>, scalar_prefetch = 0 : i64, scratch_operands = 0 : i64, tpu.core_type = #tpu.core_type<tc>, window_params = [{transform_indices = @transform_0, window_bounds = array<i64: 8, 32>}, {transform_indices = @transform_1, window_bounds = array<i64: 8, 1>}, {transform_indices = @transform_2, window_bounds = array<i64: 1, 1, 1>}]} {
    %c0 = arith.constant 0 : index
    %c0_0 = arith.constant 0 : index
    %0 = vector.load %arg1[%c0, %c0_0] : memref<8x32xf32, #tpu.memory_space<vmem>>, vector<8x32xf32>
    %c0_1 = arith.constant 0 : index
    %c0_2 = arith.constant 0 : index
    %1 = vector.load %arg2[%c0_1, %c0_2] : memref<8x1xi32, #tpu.memory_space<vmem>>, vector<8x1xi32>
    %2 = tpu.iota {dimensions = array<i32: 1>} : vector<8x32xi32>
    %3 = vector.broadcast %1 : vector<8x1xi32> to vector<8x32xi32>
    %4 = arith.cmpi eq, %2, %3 : vector<8x32xi32>
    %5 = arith.extui %4 : vector<8x32xi1> to vector<8x32xi32>
    %6 = arith.sitofp %5 : vector<8x32xi32> to vector<8x32xf32>
    %cst = arith.constant dense<0xFF800000> : vector<8xf32>
    %7 = vector.multi_reduction <maximumf>, %0, %cst [1] : vector<8x32xf32> to vector<8xf32>
    %8 = vector.shape_cast %7 : vector<8xf32> to vector<8x1xf32>
    %9 = vector.broadcast %8 : vector<8x1xf32> to vector<8x32xf32>
    %10 = arith.subf %0, %9 : vector<8x32xf32>
    %11 = math.exp %10 : vector<8x32xf32>
    %cst_3 = arith.constant dense<0.000000e+00> : vector<8xf32>
    %12 = vector.multi_reduction <add>, %11, %cst_3 [1] : vector<8x32xf32> to vector<8xf32>
    %13 = vector.shape_cast %12 : vector<8xf32> to vector<8x1xf32>
    %14 = math.log %13 : vector<8x1xf32>
    %15 = arith.addf %8, %14 : vector<8x1xf32>
    %16 = arith.mulf %0, %6 : vector<8x32xf32>
    %cst_4 = arith.constant dense<0.000000e+00> : vector<8xf32>
    %17 = vector.multi_reduction <add>, %16, %cst_4 [1] : vector<8x32xf32> to vector<8xf32>
    %18 = vector.shape_cast %17 : vector<8xf32> to vector<8x1xf32>
    %cst_5 = arith.constant dense<0.000000e+00> : vector<8xf32>
    %19 = vector.multi_reduction <add>, %6, %cst_5 [1] : vector<8x32xf32> to vector<8xf32>
    %20 = vector.shape_cast %19 : vector<8xf32> to vector<8x1xf32>
    %21 = arith.subf %15, %18 : vector<8x1xf32>
    %cst_6 = arith.constant 2.000000e-01 : f32
    %22 = vector.broadcast %cst_6 : f32 to vector<8x1xf32>
    %23 = arith.mulf %22, %20 : vector<8x1xf32>
    %cst_7 = arith.constant 1.000000e+00 : f32
    %24 = vector.broadcast %cst_7 : f32 to vector<8x1xf32>
    %25 = arith.subf %24, %23 : vector<8x1xf32>
    %c8_i32 = arith.constant 8 : i32
    %26 = arith.muli %arg0, %c8_i32 : i32
    %27 = tpu.iota {dimensions = array<i32: 0>} : vector<8x1xi32>
    %28 = vector.broadcast %26 : i32 to vector<8x1xi32>
    %29 = arith.addi %28, %27 : vector<8x1xi32>
    %c20_i32 = arith.constant 20 : i32
    %30 = vector.broadcast %c20_i32 : i32 to vector<8x1xi32>
    %31 = arith.cmpi slt, %29, %30 : vector<8x1xi32>
    %32 = arith.mulf %21, %25 : vector<8x1xf32>
    %cst_8 = arith.constant 0.000000e+00 : f32
    %33 = vector.broadcast %cst_8 : f32 to vector<8x1xf32>
    %34 = arith.select %31, %32, %33 : vector<8x1xi1>, vector<8x1xf32>
    %35 = vector.shape_cast %34 : vector<8x1xf32> to vector<1x8x1xf32>
    %cst_9 = arith.constant dense<0.000000e+00> : vector<1xf32>
    %36 = vector.multi_reduction <add>, %35, %cst_9 [1, 2] : vector<1x8x1xf32> to vector<1xf32>
    %37 = vector.shape_cast %36 : vector<1xf32> to vector<1x1x1xf32>
    %38 = vector.extract %37[0, 0, 0] : f32 from vector<1x1x1xf32>
    %39 = vector.broadcast %38 : f32 to vector<1x1x1xf32>
    %c0_10 = arith.constant 0 : index
    %c0_11 = arith.constant 0 : index
    %c0_12 = arith.constant 0 : index
    %40 = vector.load %arg3[%c0_10, %c0_11, %c0_12] : memref<1x1x1xf32, #tpu.memory_space<vmem>>, vector<1x1x1xf32>
    tpu.vector_store %arg3[%c0_10, %c0_11, %c0_12], %39 {strides = array<i32>} : memref<1x1x1xf32, #tpu.memory_space<vmem>>, vector<1x1x1xf32>,
    return
  }
  func.func @transform_0(%arg0: i32) -> (i32, i32) {
    %c0_i32 = arith.constant 0 : i32
    %c0_i32_0 = arith.constant 0 : i32
    return %arg0, %c0_i32 : i32, i32
  }
  func.func @transform_1(%arg0: i32) -> (i32, i32) {
    %c0_i32 = arith.constant 0 : i32
    %c0_i32_0 = arith.constant 0 : i32
    return %arg0, %c0_i32 : i32, i32
  }
  func.func @transform_2(%arg0: i32) -> (i32, i32, i32) {
    %c0_i32 = arith.constant 0 : i32
    %c0_i32_0 = arith.constant 0 : i32
    %c0_i32_1 = arith.constant 0 : i32
    return %arg0, %c0_i32, %c0_i32_0 : i32, i32, i32
  }
}

</mosaic_0001>

<bundles_post_ra>
// kernel: tpu_custom_call.1
= control target key start
LH: loop header
LB: loop body
LE: loop exit
PB: predicated region body
PF: predicated region fallthrough
CT: control target
= control target key end

     0   :  { %s321_s9 = smov 0   ;;  %s354_s0 = inlined_call_operand.vmem [shape: f32[20,32], index: 0, kind: input, shape index: {}]   ;;  %s355_s1 = inlined_call_operand.vmem [shape: s32[20,1], index: 1, kind: input, shape index: {}]   ;;  %s356_s2 = inlined_call_operand.vmem [shape: f32[3,1,1], index: 2, kind: output, shape index: {}]  }
   0x1 LB: > { %s327_s10 = sadd.s32 4294967295, %s302_s9   ;;  %p272_p0 = scmp.ge.s32.totalorder %s302_s9, 1  ;;  %s302_s9 = sphi %s321_s9, %s12_s9  }
   0x2   : > { %p120_p1 = scmp.lt.s32.totalorder %s302_s9, 4 }
   0x4   : > { %p121_p2 = pnand %p272_p0, %p120_p1 }
   0x5   : > { %p143_p3 = scmp.lt.s32.totalorder (!%p121_p2), %s327_s10, 2  ;;  %s276_s19 = sshll.u32 (!%p121_p2), %s327_s10, 3 }
   0x6   : > { %124 = sbr.rel (%p121_p2) target bundleno = 459 (0x1cb), region = 28 }
   0xb   : > { %v304_v0 = vmov 0   ;;  %s333_s11 = scalar_select %p143_p3, %s327_s10, 2  ;;  %vm164_vm0 = vcmask 261120   ;;  %v156_v9 = vlaneseq  ;;  %v305_v12 = vmov 0.0  }
   0xc   : > { %291 = vset.pattern.permute.xlu0 %v304_v0  ;;  %v190_v20 = vstv %s276_s19  ;;  %vm195_vm3 = vcmask 7168   ;;  %vm207_vm4 = vcmask 0  }
   0xd   : > { %s273_s12 = sshll.u32 %s333_s11, 3  ;;  %v157_v10 = vand.u32 127, %v156_v9  ;;  %v189_v18 = vshrl.u32 %v156_v9, 7  ;;  %s153_s22 = scalar_lea.vmem %s356_s2, %s333_s11 }
   0xe   : > { %s146_s15 = scalar_lea.vmem %s354_s0, %s273_s12  ;;  %s150_s18 = scalar_lea.vmem %s355_s1, %s273_s12 }
   0xf   : > { %v154_v1 = vld [vmem:[%s146_s15] sm:$0xff]  ;;  %v191_v24 = vadd.s32 %v190_v20, %v189_v18 }
  0x10   : > { %v165_v2 = vsel %vm164_vm0, %v154_v1, -inf  ;;  %v155_v3 = vld [vmem:[%s150_s18] sm:$0xff] }
  0x11   : > { %166 = vmax.xlane.f32.xlu0 %v165_v2  ;;  %vm192_vm2 = vcmp.lt.s32.totalorder %v191_v24, 20 }
  0x25   : > { %159 = vperm.xlu0 %291, %v155_v3  }
  0x84   : > { %v167_v4 = vpop.xlane.xlu0 %166 }
  0x85   : > { %v168_v5 = vsub.f32 %v154_v1, %v167_v4 }
  0x87   : > { %v169_v6 = vmul.f32 1.442695, %v168_v5 }
  0x89   : > { %292 = vpow2.f32 %v169_v6 }
  0x8f   : > { %v293_v7 = vpop.eup %292 }
  0x90   : > { %v171_v8 = vsel %vm164_vm0, %v293_v7, 0.0 }
  0x91   : > { %172 = vadd.xlane.f32.xlu1 %v171_v8 }
  0x97   : > { %v160_v11 = vpop.permute.xlu0 %159 }
  0x98   : > { %vm161_vm1 = vcmp.eq.s32.totalorder %v157_v10, %v160_v11 }
  0x99   : > { %v275_v13 = vsel %vm161_vm1, 1.0, %v305_v12 }
  0x9a   : > { %v181_v14 = vsel %vm164_vm0, %v275_v13, 0.0  ;;  %v177_v15 = vmul.f32 %v275_v13, %v154_v1 }
  0x9b   : > { %182 = vadd.xlane.f32.xlu1 %v181_v14 }
  0x9c   : > { %v178_v16 = vsel %vm164_vm0, %v177_v15, 0.0 }
  0x9d   : > { %179 = vadd.xlane.f32.xlu2 %v178_v16 }
 0x104   : > { %v173_v17 = vpop.xlane.xlu1 %172 }
 0x105   : > { %294 = vlog2.f32 %v173_v17 }
 0x10b   : > { %v295_v19 = vpop.eup %294 }
 0x10c   : > { %v175_v21 = vmul.f32 0.6931472, %v295_v19 }
 0x10e   : > { %v183_v22 = vpop.xlane.xlu1 %182  ;;  %v176_v23 = vadd.f32 %v175_v21, %v167_v4 }
 0x10f   : > { %v185_v25 = vmul.f32 0.2, %v183_v22 }
 0x110   : > { %v180_v26 = vpop.xlane.xlu2 %179 }
 0x111   : > { %v186_v27 = vsub.f32 1.0, %v185_v25  ;;  %v184_v28 = vsub.f32 %v176_v23, %v180_v26 }
 0x113   : > { %v193_v29 = vmul.f32 %v186_v27, %v184_v28 }
 0x115   : > { %v194_v30 = vsel %vm192_vm2, %v193_v29, 0.0 }
 0x116   : > { %v196_v31 = vsel %vm195_vm3, %v194_v30, 0.0 }
 0x117   : > { %197 = vadd.xlane.f32.xlu2 %v196_v31 }
 0x18a   : > { %v198_v32 = vpop.xlane.xlu2 %197 }
 0x18b   : > { %v199_v33 = vrot.slane %v198_v32, 4 }
 0x18d   : > { %v200_v34 = vadd.f32 %v199_v33, %v198_v32 }
 0x18f   : > { %v201_v35 = vrot.slane %v200_v34, 2 }
 0x191   : > { %v202_v36 = vadd.f32 %v201_v35, %v200_v34 }
 0x193   : > { %v203_v37 = vrot.slane %v202_v36, 1 }
 0x195   : > { %v204_v38 = vadd.f32 %v203_v37, %v202_v36 }
 0x197   : > { %279 = vpush %v204_v38 }
 0x1c8   : > { %s280_s23 = spop %279 }
 0x1c9   : > { %v206_v39 = vstv %s280_s23 }
 0x1ca   : > { %208 = vst.msk [vmem:[%s153_s22] sm:$0x1] %vm207_vm4, %v206_v39 }
 0x1cb PF: > { %s12_s9 = sadd.s32 1, %s302_s9  }
 0x1cc   : > { %p9_p4 = scmp.ge.s32.totalorder %s12_s9, 5  }
 0x1ce   :  { %11 = sbr.rel (!%p9_p4) target bundleno = 1 (0x1), region = 61 }

</bundles_post_ra>
